<compile_context>
chip_gen: v6e
topology: v6e:2x2x1
jax: 0.10.0
libtpu: 0.0.40
codegen_flags: <defaults>
</compile_context>

<pallas_src>
import math

import jax
import jax.numpy as jnp
from jax.experimental import pallas as pl
from jax.experimental.pallas import tpu as pltpu


# ----------------------------- Pallas kernel ------------------------------ #
def _lstm_fused_kernel(x_ref, h0_ref, c0_ref, wx_ref, wh_ref, b_ref,
                       hseq_ref, hfin_ref, cfin_ref):
    # x_ref   : (B*S, D)   inputs, flattened batch-major (row = b*S + s)
    # h0_ref  : (B, H)     initial hidden state
    # c0_ref  : (B, H)     initial cell   state
    # wx_ref  : (D, 4H)    fused input  weights, gate order [i, f, o, g]
    # wh_ref  : (H, 4H)    fused hidden weights, gate order [i, f, o, g]
    # b_ref   : (1, 4H)    pre-summed biases (b_i* + b_h*), same gate order
    # hseq_ref: (S, B*H)   hidden sequence, lane-contiguous slab
    # hfin_ref: (B, H)     hidden state of the last timestep
    # cfin_ref: (B, H)     cell  state of the last timestep
    N, _ = x_ref.shape
    B, H = h0_ref.shape
    S = N // B
    G = 4 * H

    # Recurrent contribution is time-invariant (reference quirk: h_t/c_t are
    # never updated inside the torch loop) -> computed exactly once.
    rec = jnp.dot(h0_ref[...], wh_ref[...],
                  preferred_element_type=jnp.float32) + b_ref[...]          # (B, 4H)

    # Broadcast per-batch constants to every timestep row (layout-preserving:
    # sublane broadcast + leading-dim collapse, no data movement).
    rec_rep = jnp.broadcast_to(rec[:, None, :], (B, S, G)).reshape(N, G)    # (B*S, 4H)
    c0_rep = jnp.broadcast_to(c0_ref[...][:, None, :], (B, S, H)).reshape(N, H)

    # One fused, lane-dense MXU push for the whole batch*sequence, all gates.
    gates = jnp.dot(x_ref[...], wx_ref[...],
                    preferred_element_type=jnp.float32) + rec_rep           # (B*S, 4H)

    # Gate order [i, f, o, g]: one full-width sigmoid pass over the first 3H
    # lanes, one tanh pass over the last H lanes (no discarded-lane work).
    sig = jax.nn.sigmoid(gates[:, :3 * H])
    i = sig[:, 0 * H:1 * H]
    f = sig[:, 1 * H:2 * H]
    o = sig[:, 2 * H:3 * H]
    g = jnp.tanh(gates[:, 3 * H:])

    c = f * c0_rep + i * g                   # (B*S, H)
    h = o * jnp.tanh(c)                      # (B*S, H)

    # Re-pack (B*S, H) rows into the (S, B*H) output slab; store per batch so
    # live state stays bounded.  B is small & static -> unrolled at trace time.
    for b in range(B):
        rows = slice(b * S, (b + 1) * S)
        last = slice((b + 1) * S - 1, (b + 1) * S)
        hseq_ref[:, b * H:(b + 1) * H] = h[rows, :]
        hfin_ref[b:b + 1, :] = h[last, :]
        cfin_ref[b:b + 1, :] = c[last, :]


# ------------------------------- wrapper ----------------------------------- #
def simple_lstm_forward(inputs, state, params):
    """inputs: (B, S, D); state: None or (h, c) each (1, B, H) (torch contract).

    Returns (hidden_seq (S, B, H), (h_final (1,B,H), c_final (1,B,H))),
    matching the PyTorch module's forward (including its fixed-state quirk).
    """
    wx, wh, b = params                        # (D, 4H), (H, 4H), (1, 4H)
    B, S, D = inputs.shape
    H = wh.shape[0]

    if state is None:
        # torch builds (H, 1) zeros that broadcast over batch -> equivalent to
        # zero (B, H) initial states.
        h0 = jnp.zeros((B, H), jnp.float32)
        c0 = jnp.zeros((B, H), jnp.float32)
    else:
        # torch does h.squeeze(0).t(); in our batch-major math that is just
        # the (B, H) slice of the (1, B, H) state.
        h, c = state
        h0, c0 = h[0], c[0]
        if h0.dtype != jnp.float32:
            h0 = h0.astype(jnp.float32)
        if c0.dtype != jnp.float32:
            c0 = c0.astype(jnp.float32)

    # Cast only when needed; (B, S, D) -> (B*S, D) is a free view.
    x = inputs if inputs.dtype == jnp.float32 else inputs.astype(jnp.float32)
    x2d = x.reshape(B * S, D)

    vmem = pl.BlockSpec(memory_space=pltpu.MemorySpace.VMEM)

    # Everything (~25 KiB) is VMEM-resident; single invocation, no grid.
    # (At production shapes: add a grid over S/B, "parallel" semantics for the
    # v7x dual-TensorCore split, and size tiles against 64 MiB VMEM.)
    hseq_flat, h_fin, c_fin = pl.pallas_call(
        _lstm_fused_kernel,
        out_shape=(
            jax.ShapeDtypeStruct((S, B * H), jnp.float32),
            jax.ShapeDtypeStruct((B, H), jnp.float32),
            jax.ShapeDtypeStruct((B, H), jnp.float32),
        ),
        in_specs=[vmem] * 6,
        out_specs=(vmem, vmem, vmem),
    )(x2d, h0, c0, wx, wh, b)

    hidden_seq = hseq_flat.reshape(S, B, H)   # free reshape (trailing-dim split)
    h_final = h_fin[None]                     # (1, B, H) == last-step h_next_t
    c_final = c_fin[None]                     # (1, B, H) == last-step c_next_t
    return hidden_seq, (h_final, c_final)


# --------------------------- parameter creation ---------------------------- #
def init_params(key, input_size, hidden_size):
    """Mimics torch reset_parameters (uniform +/- 1/sqrt(H)), then fuses the
    per-gate tensors into the kernel layout:
        wx (D, 4H), wh (H, 4H), b (1, 4H) with gate order [i, f, o, g]
    and pre-summed biases (b_i* + b_h*).
    """
    stdv = 1.0 / math.sqrt(hidden_size)
    keys = jax.random.split(key, 16)

    def u(k, shape):
        return jax.random.uniform(k, shape, jnp.float32, -stdv, stdv)

    # torch shapes: w_i* (H, D), w_h* (H, H), b_* (H, 1)
    w_ii, w_if, w_ig, w_io = (u(keys[i], (hidden_size, input_size)) for i in range(4))
    w_hi, w_hf, w_hg, w_ho = (u(keys[4 + i], (hidden_size, hidden_size)) for i in range(4))
    b_ii, b_if, b_ig, b_io = (u(keys[8 + i], (hidden_size, 1)) for i in range(4))
    b_hi, b_hf, b_hg, b_ho = (u(keys[12 + i], (hidden_size, 1)) for i in range(4))

    # Gate order [i, f, o, g]: sigmoid gates first, tanh gate last.
    wx = jnp.concatenate([w_ii.T, w_if.T, w_io.T, w_ig.T], axis=1)       # (D, 4H)
    wh = jnp.concatenate([w_hi.T, w_hf.T, w_ho.T, w_hg.T], axis=1)       # (H, 4H)
    b = jnp.concatenate([(b_ii + b_hi).T, (b_if + b_hf).T,
                         (b_io + b_ho).T, (b_ig + b_hg).T], axis=1)      # (1, 4H)
    return wx, wh, b


# ------------------------------ pure-JAX ref -------------------------------- #
def lstm_ref(inputs, state, params):
    """Pure-JAX transcription of the torch forward, using the packed params."""
    wx, wh, b = params
    B, S, D = inputs.shape
    H = wh.shape[0]
    if state is None:
        h0 = jnp.zeros((B, H), jnp.float32)
        c0 = jnp.zeros((B, H), jnp.float32)
    else:
        h0, c0 = state[0][0], state[1][0]

    hs = []
    for t in range(S):
        x = inputs[:, t, :]
        gates = x @ wx + h0 @ wh + b
        i = jax.nn.sigmoid(gates[:, 0 * H:1 * H])
        f = jax.nn.sigmoid(gates[:, 1 * H:2 * H])
        o = jax.nn.sigmoid(gates[:, 2 * H:3 * H])
        g = jnp.tanh(gates[:, 3 * H:4 * H])
        c_next = f * c0 + i * g
        h_next = o * jnp.tanh(c_next)
        hs.append(h_next)          # NOTE: h0/c0 intentionally NOT updated
    hseq = jnp.stack(hs, axis=0)
    return hseq, (h_next[None], c_next[None])


# ----------------------------------- main ----------------------------------- #
if __name__ == "__main__":
    INPUT_SIZE = 16
    HIDDEN_SIZE = 32
    SEQ_LENGTH = 8
    BATCH = 2

    key = jax.random.PRNGKey(0)
    k_param, k_x, k_h, k_c = jax.random.split(key, 4)

    params = init_params(k_param, INPUT_SIZE, HIDDEN_SIZE)

    inputs = jax.random.normal(k_x, (BATCH, SEQ_LENGTH, INPUT_SIZE), jnp.float32)
    h_init = jax.random.normal(k_h, (1, BATCH, HIDDEN_SIZE), jnp.float32)
    c_init = jax.random.normal(k_c, (1, BATCH, HIDDEN_SIZE), jnp.float32)
    state = (h_init, c_init)

    fwd = jax.jit(simple_lstm_forward)
    hidden_seq, (h_final, c_final) = fwd(inputs, state, params)
    jax.block_until_ready((hidden_seq, h_final, c_final))

    # correctness check against a pure-JAX reference of the torch forward
    hseq_ref, (hf_ref, cf_ref) = lstm_ref(inputs, state, params)
    assert hidden_seq.shape == (SEQ_LENGTH, BATCH, HIDDEN_SIZE)
    assert h_final.shape == (1, BATCH, HIDDEN_SIZE)
    assert c_final.shape == (1, BATCH, HIDDEN_SIZE)
    assert jnp.allclose(hidden_seq, hseq_ref, atol=1e-5, rtol=1e-5)
    assert jnp.allclose(h_final, hf_ref, atol=1e-5, rtol=1e-5)
    assert jnp.allclose(c_final, cf_ref, atol=1e-5, rtol=1e-5)

    # also exercise the state=None path (torch zeros-state branch)
    hseq0, (hf0, cf0) = jax.jit(simple_lstm_forward)(inputs, None, params)
    hseq0_ref, (hf0_ref, cf0_ref) = lstm_ref(inputs, None, params)
    jax.block_until_ready((hseq0, hf0, cf0))
    assert jnp.allclose(hseq0, hseq0_ref, atol=1e-5, rtol=1e-5)
    assert jnp.allclose(hf0, hf0_ref, atol=1e-5, rtol=1e-5)
    assert jnp.allclose(cf0, cf0_ref, atol=1e-5, rtol=1e-5)

    print("KERNEL_OK")
</pallas_src>

<mosaic_0001>
module attributes {stable_mosaic.version = 11 : i64} {
  func.func @_lstm_fused_kernel(%arg0: memref<16x16xf32, #tpu.memory_space<vmem>>, %arg1: memref<2x32xf32, #tpu.memory_space<vmem>>, %arg2: memref<2x32xf32, #tpu.memory_space<vmem>>, %arg3: memref<16x128xf32, #tpu.memory_space<vmem>>, %arg4: memref<32x128xf32, #tpu.memory_space<vmem>>, %arg5: memref<1x128xf32, #tpu.memory_space<vmem>>, %arg6: memref<8x64xf32, #tpu.memory_space<vmem>>, %arg7: memref<2x32xf32, #tpu.memory_space<vmem>>, %arg8: memref<2x32xf32, #tpu.memory_space<vmem>>) attributes {dimension_semantics = [], scalar_prefetch = 0 : i64, scratch_operands = 0 : i64, tpu.core_type = #tpu.core_type<tc>} {
    %c0 = arith.constant 0 : index
    %c0_0 = arith.constant 0 : index
    %0 = vector.load %arg1[%c0, %c0_0] : memref<2x32xf32, #tpu.memory_space<vmem>>, vector<2x32xf32>
    %c0_1 = arith.constant 0 : index
    %c0_2 = arith.constant 0 : index
    %1 = vector.load %arg4[%c0_1, %c0_2] : memref<32x128xf32, #tpu.memory_space<vmem>>, vector<32x128xf32>
    %cst = arith.constant dense<0.000000e+00> : vector<2x128xf32>
    %2 = tpu.matmul %0, %1, %cst {dimension_numbers = #tpu.dot_dimension_numbers<[1], [0], [0], [1], [0, 0, 1, 1], [], []>} : vector<2x32xf32>, vector<32x128xf32>, vector<2x128xf32> -> vector<2x128xf32>
    %c0_3 = arith.constant 0 : index
    %c0_4 = arith.constant 0 : index
    %3 = vector.load %arg5[%c0_3, %c0_4] : memref<1x128xf32, #tpu.memory_space<vmem>>, vector<1x128xf32>
    %4 = vector.broadcast %3 : vector<1x128xf32> to vector<2x128xf32>
    %5 = arith.addf %2, %4 : vector<2x128xf32>
    %6 = vector.shape_cast %5 : vector<2x128xf32> to vector<2x1x128xf32>
    %7 = vector.shape_cast %6 : vector<2x1x128xf32> to vector<2x1x128xf32>
    %8 = vector.broadcast %7 : vector<2x1x128xf32> to vector<2x8x128xf32>
    %9 = vector.shape_cast %8 : vector<2x8x128xf32> to vector<16x128xf32>
    %c0_5 = arith.constant 0 : index
    %c0_6 = arith.constant 0 : index
    %10 = vector.load %arg2[%c0_5, %c0_6] : memref<2x32xf32, #tpu.memory_space<vmem>>, vector<2x32xf32>
    %11 = vector.shape_cast %10 : vector<2x32xf32> to vector<2x1x32xf32>
    %12 = vector.shape_cast %11 : vector<2x1x32xf32> to vector<2x1x32xf32>
    %13 = vector.broadcast %12 : vector<2x1x32xf32> to vector<2x8x32xf32>
    %14 = vector.shape_cast %13 : vector<2x8x32xf32> to vector<16x32xf32>
    %c0_7 = arith.constant 0 : index
    %c0_8 = arith.constant 0 : index
    %15 = vector.load %arg0[%c0_7, %c0_8] : memref<16x16xf32, #tpu.memory_space<vmem>>, vector<16x16xf32>
    %c0_9 = arith.constant 0 : index
    %c0_10 = arith.constant 0 : index
    %16 = vector.load %arg3[%c0_9, %c0_10] : memref<16x128xf32, #tpu.memory_space<vmem>>, vector<16x128xf32>
    %cst_11 = arith.constant dense<0.000000e+00> : vector<16x128xf32>
    %17 = tpu.matmul %15, %16, %cst_11 {dimension_numbers = #tpu.dot_dimension_numbers<[1], [0], [0], [1], [0, 0, 1, 1], [], []>} : vector<16x16xf32>, vector<16x128xf32>, vector<16x128xf32> -> vector<16x128xf32>
    %18 = arith.addf %17, %9 : vector<16x128xf32>
    %19 = vector.extract_strided_slice %18 {offsets = [0, 0], sizes = [16, 96], strides = [1, 1]} : vector<16x128xf32> to vector<16x96xf32>
    %20 = arith.negf %19 : vector<16x96xf32>
    %21 = math.exp %20 : vector<16x96xf32>
    %cst_12 = arith.constant 1.000000e+00 : f32
    %22 = vector.broadcast %cst_12 : f32 to vector<16x96xf32>
    %23 = arith.addf %22, %21 : vector<16x96xf32>
    %24 = arith.divf %22, %23 : vector<16x96xf32>
    %25 = vector.extract_strided_slice %24 {offsets = [0, 0], sizes = [16, 32], strides = [1, 1]} : vector<16x96xf32> to vector<16x32xf32>
    %26 = vector.extract_strided_slice %24 {offsets = [0, 32], sizes = [16, 32], strides = [1, 1]} : vector<16x96xf32> to vector<16x32xf32>
    %27 = vector.extract_strided_slice %24 {offsets = [0, 64], sizes = [16, 32], strides = [1, 1]} : vector<16x96xf32> to vector<16x32xf32>
    %28 = vector.extract_strided_slice %18 {offsets = [0, 96], sizes = [16, 32], strides = [1, 1]} : vector<16x128xf32> to vector<16x32xf32>
    %29 = math.tanh %28 : vector<16x32xf32>
    %30 = arith.mulf %26, %14 : vector<16x32xf32>
    %31 = arith.mulf %25, %29 : vector<16x32xf32>
    %32 = arith.addf %30, %31 : vector<16x32xf32>
    %33 = math.tanh %32 : vector<16x32xf32>
    %34 = arith.mulf %27, %33 : vector<16x32xf32>
    %35 = vector.extract_strided_slice %34 {offsets = [0, 0], sizes = [8, 32], strides = [1, 1]} : vector<16x32xf32> to vector<8x32xf32>
    %c0_13 = arith.constant 0 : index
    %c0_14 = arith.constant 0 : index
    %36 = vector.load %arg6[%c0_13, %c0_14] : memref<8x64xf32, #tpu.memory_space<vmem>>, vector<8x32xf32>
    tpu.vector_store %arg6[%c0_13, %c0_14], %35 {strides = array<i32>} : memref<8x64xf32, #tpu.memory_space<vmem>>, vector<8x32xf32>,
    %37 = vector.extract_strided_slice %34 {offsets = [7, 0], sizes = [1, 32], strides = [1, 1]} : vector<16x32xf32> to vector<1x32xf32>
    %c0_15 = arith.constant 0 : index
    %c0_16 = arith.constant 0 : index
    %38 = vector.load %arg7[%c0_15, %c0_16] : memref<2x32xf32, #tpu.memory_space<vmem>>, vector<1x32xf32>
    tpu.vector_store %arg7[%c0_15, %c0_16], %37 {strides = array<i32>} : memref<2x32xf32, #tpu.memory_space<vmem>>, vector<1x32xf32>,
    %39 = vector.extract_strided_slice %32 {offsets = [7, 0], sizes = [1, 32], strides = [1, 1]} : vector<16x32xf32> to vector<1x32xf32>
    %c0_17 = arith.constant 0 : index
    %c0_18 = arith.constant 0 : index
    %40 = vector.load %arg8[%c0_17, %c0_18] : memref<2x32xf32, #tpu.memory_space<vmem>>, vector<1x32xf32>
    tpu.vector_store %arg8[%c0_17, %c0_18], %39 {strides = array<i32>} : memref<2x32xf32, #tpu.memory_space<vmem>>, vector<1x32xf32>,
    %41 = vector.extract_strided_slice %34 {offsets = [8, 0], sizes = [8, 32], strides = [1, 1]} : vector<16x32xf32> to vector<8x32xf32>
    %c0_19 = arith.constant 0 : index
    %c32 = arith.constant 32 : index
    %42 = vector.load %arg6[%c0_19, %c32] : memref<8x64xf32, #tpu.memory_space<vmem>>, vector<8x32xf32>
    tpu.vector_store %arg6[%c0_19, %c32], %41 {strides = array<i32>} : memref<8x64xf32, #tpu.memory_space<vmem>>, vector<8x32xf32>,
    %43 = vector.extract_strided_slice %34 {offsets = [15, 0], sizes = [1, 32], strides = [1, 1]} : vector<16x32xf32> to vector<1x32xf32>
    %c1 = arith.constant 1 : index
    %c0_20 = arith.constant 0 : index
    %44 = vector.load %arg7[%c1, %c0_20] : memref<2x32xf32, #tpu.memory_space<vmem>>, vector<1x32xf32>
    tpu.vector_store %arg7[%c1, %c0_20], %43 {strides = array<i32>} : memref<2x32xf32, #tpu.memory_space<vmem>>, vector<1x32xf32>,
    %45 = vector.extract_strided_slice %32 {offsets = [15, 0], sizes = [1, 32], strides = [1, 1]} : vector<16x32xf32> to vector<1x32xf32>
    %c1_21 = arith.constant 1 : index
    %c0_22 = arith.constant 0 : index
    %46 = vector.load %arg8[%c1_21, %c0_22] : memref<2x32xf32, #tpu.memory_space<vmem>>, vector<1x32xf32>
    tpu.vector_store %arg8[%c1_21, %c0_22], %45 {strides = array<i32>} : memref<2x32xf32, #tpu.memory_space<vmem>>, vector<1x32xf32>,
    return
  }
}

</mosaic_0001>

<bundles_post_ra>
// kernel: simple_lstm_forward.1
= control target key start
LH: loop header
LB: loop body
LE: loop exit
PB: predicated region body
PF: predicated region fallthrough
CT: control target
= control target key end

     0   :  { %14 = vsyncpa [#allocation3], 0  ;;  %s696_s0 = inlined_call_operand.hbm [shape: f32[16,16], index: 0, kind: input, shape index: {}]   ;;  %s697_s1 = inlined_call_operand.vmem [shape: f32[2,32], index: 1, kind: input, shape index: {}]   ;;  %s698_s2 = inlined_call_operand.vmem [shape: f32[2,32], index: 2, kind: input, shape index: {}]   ;;  %s699_s3 = inlined_call_operand.hbm [shape: f32[16,128], index: 3, kind: input, shape index: {}]   ;;  %s700_s4 = inlined_call_operand.hbm [shape: f32[32,128], index: 4, kind: input, shape index: {}]   ;;  %s701_s5 = inlined_call_operand.vmem [shape: f32[1,128], index: 5, kind: input, shape index: {}]   ;;  %s702_s6 = inlined_call_operand.vmem [shape: f32[8,64], index: 6, kind: output, shape index: {0}]   ;;  %s703_s7 = inlined_call_operand.hbm [shape: f32[2,32], index: 7, kind: output, shape index: {1}]   ;;  %s704_s8 = inlined_call_operand.hbm [shape: f32[2,32], index: 8, kind: output, shape index: {2}]  }
   0x1   :  { %15 = vsyncpa [#allocation6], 0 }
   0x2   :  { %16 = vsyncpa [#allocation4], 0 }
   0x3   :  { %17 = vsyncpa [#allocation10], 0  ;;  %s592_s27 = smov [#allocation5]   ;;  %s593_s29 = smov [#allocation2]  }
   0x4   :  { %s39_s28 = sshll.u32 %s592_s27, 4  ;;  %s23_s30 = sshll.u32 %s593_s29, 4  ;;  %s40_s28 = int_to_ptr.vmem [resolvable:$true] %s39_s28  ;;  %s24_s30 = int_to_ptr.vmem [resolvable:$true] %s23_s30 }
   0x5   :  { %s492_s9 = scalar_lea.vmem %s40_s28, 256  ;;  %p497_p1 = scmp.lt.s32.totalorder %s40_s28, %s40_s28 }
   0x6   :  { %p493_p0 = scmp.ne.s32.totalorder %s40_s28, %s492_s9  ;;  %p498_p2 = scmp.lt.s32.totalorder %s492_s9, %s492_s9 }
   0x8   :  { %p499_p3 = por %p498_p2, %p497_p1 }
   0xa   :  { %p500_p4 = pnand %p499_p3, %p493_p0 }
   0xc   :  { %503 = shalt.err (!%p500_p4)
}
   0xd   :  { %s594_s10 = smov 128   ;;  %s595_s11 = smov 8  }
   0xe   :  { %45 = dma.hbm_to_vmem [thread:$0]  %s699_s3, 256, %s40_s28, [#allocation6], %s594_s10, %s594_s10, %s595_s11  }
   0xf   :  { %s512_s14 = scalar_lea.vmem %s24_s30, 256  ;;  %p517_p6 = scmp.lt.s32.totalorder %s24_s30, %s24_s30 }
  0x10   :  { %p513_p5 = scmp.ne.s32.totalorder %s24_s30, %s512_s14  ;;  %p518_p7 = scmp.lt.s32.totalorder %s512_s14, %s512_s14 }
  0x12   :  { %p519_p8 = por %p518_p7, %p517_p6 }
  0x14   :  { %p520_p9 = pnand %p519_p8, %p513_p5 }
  0x16   :  { %523 = shalt.err (!%p520_p9)
}
  0x17   :  { %29 = dma.hbm_to_vmem [thread:$0]  %s696_s0, 256, %s24_s30, [#allocation3], %s594_s10, %s594_s10, %s595_s11  }
  0x18   :  { %s596_s17 = smov [#allocation7]  }
  0x19   :  { %s51_s18 = sshll.u32 %s596_s17, 4  ;;  %s52_s18 = int_to_ptr.vmem [resolvable:$true] %s51_s18 }
  0x1a   :  { %s532_s19 = scalar_lea.vmem %s52_s18, 512  ;;  %p537_p11 = scmp.lt.s32.totalorder %s52_s18, %s52_s18 }
  0x1b   :  { %p533_p10 = scmp.ne.s32.totalorder %s52_s18, %s532_s19  ;;  %p538_p12 = scmp.lt.s32.totalorder %s532_s19, %s532_s19 }
  0x1d   :  { %p539_p13 = por %p538_p12, %p537_p11 }
  0x1f   :  { %p540_p0 = pnand %p539_p13, %p533_p10 }
  0x21   :  { %543 = shalt.err (!%p540_p0)
}
  0x22   :  { %57 = dma.hbm_to_vmem [thread:$0]  %s700_s4, 512, %s52_s18, [#allocation6], %s594_s10, %s594_s10, %s595_s11  }
  0x23   :  { %584 = dma.done.wait [#allocation3], 256  }
  0x24   :  { %585 = vsyncadd [#allocation3], 4294967040 }
  0x25   :  { %586 = dma.done.wait [#allocation6], 768  }
  0x26   :  { %587 = vsyncadd [#allocation6], 4294966528  ;;  %v597_v0 = vmov 0.0   ;;  %vm598_vm0 = vmmov 0   ;;  %v159_v1 = vlaneseq  ;;  %v599_v2 = vmov 1966171168  }
  0x27   :  { %437 = vmatprep.subr.mxu0 %v597_v0  ;;  %445 = vmatprep.mubr.msk.f32.mxu0 %vm598_vm0, %v597_v0  ;;  %v157_v3 = vunpack.c.l.s4 %v599_v2  ;;  %v73_v6 = vld [vmem:[#allocation7 + $0x18] sm:$0xff]  ;;  %v72_v7 = vld [vmem:[#allocation7 + $0x10] sm:$0xff]  ;;  %v71_v10 = vld [vmem:[#allocation7 + $0x8] sm:$0xff]  ;;  %vm224_vm1 = vcmask 130048   ;;  %vm81_vm2 = vcmask 261120   ;;  %s602_s24 = smov 64  }
  0x28   :  { %v160_v4 = vshrl.u32 %v159_v1, 7  ;;  %438 = vmatpush3.msra.mxu0 %v73_v6  ;;  %v223_v9 = vld [vmem:[#allocation5 + $0x8] sm:$0xff]  ;;  %v222_v11 = vld [vmem:[#allocation5] sm:$0xff]  ;;  %v220_v13 = vld [vmem:[#allocation2] sm:$0xff]  ;;  %vm365_vm3 = vcmask 261127   ;;  %s603_s25 = smov [#allocation9]  }
  0x29   :  { %v158_v5 = vunpack.c.0.s8 %v157_v3  ;;  %439 = vmatprep.subr.mxu0 %v597_v0  ;;  %448 = vmatprep.subr.mxu1 %v223_v9  ;;  %v423_v14 = vld.sshfl [vmem:[%s698_s2] sm:$0x11 pattern:$0x75316420]  ;;  %v221_v16 = vld [vmem:[#allocation2 + $0x8] sm:$0xff]  ;;  %s600_s2 = smov 32  }
  0x2a   :  { %v180_v12 = vsub.s32 0, %v160_v4  ;;  %440 = vmatpush3.msra.mxu0 %v72_v7  ;;  %449 = vmatpush3.msra.mxu1 %v223_v9  ;;  %v70_v15 = vld [vmem:[#allocation7] sm:$0xff]  ;;  %v197_v18 = vcombine.high %v423_v14, %v423_v14  ;;  %s405_s26 = sshll.u32 %s603_s25, 4  ;;  %s406_s26 = int_to_ptr.vmem [resolvable:$true] %s405_s26 }
  0x2b   :  { %v161_v8 = vsub.s32 %v158_v5, %v160_v4  ;;  %441 = vmatprep.subr.mxu0 %v597_v0  ;;  %450 = vmatprep.subr.mxu1 %v222_v11  ;;  %v69_v19 = vld [vmem:[%s697_s1] sm:$0x3]  ;;  %s544_s27 = scalar_lea.vmem %s406_s26, 32  ;;  %p549_p2 = scmp.lt.s32.totalorder %s406_s26, %s406_s26 }
  0x2c   :  { %442 = vmatpush3.msra.mxu0 %v71_v10  ;;  %451 = vmatpush3.msra.mxu1 %v222_v11  ;;  %v421_v23 = vld [vmem:[%s701_s5] ss:$0 sm:$0xff]  ;;  %s601_s5 = smov 96   ;;  %p545_p1 = scmp.ne.s32.totalorder %s406_s26, %s544_s27 }
  0x2d   :  { %v204_v17 = vrot.slane %v423_v14, %v161_v8  ;;  %443 = vmatprep.subr.mxu0 %v597_v0  ;;  %452 = vmatprep.mubr.msk.f32.mxu1 %vm224_vm1, %v220_v13  ;;  %v211_v21 = vrot.slane %v197_v18, %v161_v8  ;;  %p550_p3 = scmp.lt.s32.totalorder %s544_s27, %s544_s27 }
  0x2e   :  { %444 = vmatpush3.msra.mxu0 %v70_v15  ;;  %453 = vmatmul.mubr.msk.f32.vlgmr.msra.gmra.mxu1 %vm224_vm1, %v221_v16 }
  0x2f   :  { %v215_v20 = vrot.slane %v204_v17, %v180_v12  ;;  %446 = vmatmul.mubr.msk.f32.vlgmr.msra.gmra.mxu0 %vm81_vm2, %v69_v19  ;;  %v219_v22 = vrot.slane %v211_v21, %v180_v12  ;;  %p551_p4 = por %p550_p3, %p549_p2 }
  0x31   :  { %320 = vrot.lane.b32.xlu1 %v215_v20, %s600_s2  ;;  %p552_p5 = pnand %p551_p4, %p545_p1 }
  0x35   :  { %322 = vrot.lane.b32.xlu1 %v219_v22, %s600_s2 }
  0xa3   :  { %v321_v51 = vpop.permute.xlu1 %320 }
  0xa7   :  { %v323_v53 = vpop.permute.xlu1 %322 }
  0xee   :  { %v454_v28 = vpop.f32.mrf.mxu1 }
  0xef   :  { %v151_v24 = vpop.f32.mrf.mxu0 }
  0xf0   :  { %v152_v25 = vadd.f32 %v421_v23, %v151_v24  ;;  %v297_v33 = vpop.f32.mrf.mxu1 }
  0xf1   :  { %v447_v26 = vpop.f32.mrf.mxu0 }
  0xf2   :  { %v162_v27 = vrot.slane %v152_v25, %v161_v8 }
  0xf4   :  { %v163_v29 = vcombine.high %v162_v27, %v162_v27  ;;  %v170_v30 = vrot.slane %v162_v27, %v161_v8 }
  0xf6   :  { %v177_v31 = vrot.slane %v163_v29, %v161_v8  ;;  %v181_v32 = vrot.slane %v170_v30, %v180_v12 }
  0xf8   :  { %v185_v34 = vrot.slane %v177_v31, %v180_v12  ;;  %v298_v35 = vadd.f32 %v297_v33, %v181_v32 }
  0xfa   :  { %v303_v36 = vadd.f32 %v454_v28, %v185_v34  ;;  %468 = vtanh.f32 %v298_v35  ;;  %v426_v39 = vmul.f32 -1.442695, %v298_v35 }
  0xfc   :  { %470 = vtanh.f32 %v303_v36  ;;  %v427_v40 = vmul.f32 -1.442695, %v303_v36 }
  0xfd   :  { %472 = vpow2.f32 %v426_v39 }
  0xfe   :  { %474 = vpow2.f32 %v427_v40 }
 0x107   :  { %v469_v37 = vpop.eup %468 }
 0x108   :  { %330 = vrot.lane.b32.xlu0 %v469_v37, %s600_s2 }
 0x109   :  { %v471_v38 = vpop.eup %470 }
 0x10a   :  { %v473_v41 = vpop.eup %472 }
 0x10b   :  { %v312_v42 = vadd.f32 1.0, %v473_v41  ;;  %v475_v43 = vpop.eup %474 }
 0x10c   :  { %332 = vrot.lane.b32.xlu0 %v471_v38, %s600_s2  ;;  %v313_v44 = vadd.f32 1.0, %v475_v43 }
 0x10d   :  { %476 = vrcp.f32 %v312_v42 }
 0x10e   :  { %478 = vrcp.f32 %v313_v44 }
 0x11a   :  { %v477_v45 = vpop.eup %476 }
 0x11b   :  { %v479_v48 = vpop.eup %478  ;;  %v326_v52 = vmul.f32 %v477_v45, %v321_v51 }
 0x11c   :  { %v327_v56 = vmul.f32 %v479_v48, %v323_v53 }
 0x17a   :  { %v331_v46 = vpop.permute.xlu0 %330 }
 0x17b   :  { %v336_v47 = vmul.f32 %v477_v45, %v331_v46 }
 0x17d   :  { %340 = vrot.lane.b32.xlu0 %v336_v47, %s600_s2 }
 0x17e   :  { %v333_v49 = vpop.permute.xlu0 %332 }
 0x17f   :  { %v337_v50 = vmul.f32 %v479_v48, %v333_v49 }
 0x181   :  { %342 = vrot.lane.b32.xlu1 %v337_v50, %s600_s2 }
 0x1ef   :  { %v341_v54 = vpop.permute.xlu0 %340 }
 0x1f0   :  { %v346_v55 = vadd.f32 %v341_v54, %v326_v52 }
 0x1f2   :  { %480 = vtanh.f32 %v346_v55 }
 0x1f3   :  { %v343_v57 = vpop.permute.xlu1 %342 }
 0x1f4   :  { %v347_v58 = vadd.f32 %v343_v57, %v327_v56 }
 0x1f6   :  { %482 = vtanh.f32 %v347_v58 }
 0x1ff   :  { %v481_v59 = vpop.eup %480 }
 0x200   :  { %352 = vrot.lane.b32.xlu0 %v481_v59, %s600_s2 }
 0x203   :  { %v483_v60 = vpop.eup %482 }
 0x204   :  { %354 = vrot.lane.b32.xlu1 %v483_v60, %s600_s2 }
 0x208   :  { %368 = vrot.lane.b32.xlu1 %v346_v55, %s601_s5 }
 0x20c   :  { %383 = vrot.lane.b32.xlu1 %v347_v58, %s601_s5 }
 0x272   :  { %v353_v61 = vpop.permute.xlu0 %352 }
 0x273   :  { %v358_v62 = vmul.f32 %v477_v45, %v353_v61 }
 0x275   :  { %361 = vrot.lane.b32.xlu0 %v358_v62, %s602_s24 }
 0x276   :  { %v355_v63 = vpop.permute.xlu1 %354 }
 0x277   :  { %v359_v0 = vmul.f32 %v479_v48, %v355_v63 }
 0x279   :  { %378 = vrot.lane.b32.xlu0 %v359_v0, %s602_s24 }
 0x27a   :  { %v369_v1 = vpop.permute.xlu1 %368 }
 0x27b   :  { %371 = vst.msk [vmem:[#allocation9 - $0x7] sm:$0x80] %vm365_vm3, %v369_v1 }
 0x27d   :  { %373 = vrot.lane.b32.xlu0 %v359_v0, %s601_s5 }
 0x27e   :  { %v384_v2 = vpop.permute.xlu1 %383 }
 0x27f   :  { %386 = vst.msk [vmem:[#allocation9 - $0x6] sm:$0x80] %vm365_vm3, %v384_v2 }
 0x280   :  { %555 = shalt.err (!%p552_p5)
}
 0x281   :  { %408 = dma.vmem_to_hbm [thread:$0]  %s406_s26, 32, %s704_s8, [#allocation10]   ;;  %vm376_vm4 = vcmask 523520  }
 0x282   :  { %s604_s30 = smov [#allocation8]  }
 0x283   :  { %s395_s9 = sshll.u32 %s604_s30, 4  ;;  %s396_s9 = int_to_ptr.vmem [resolvable:$true] %s395_s9 }
 0x284   :  { %s564_s12 = scalar_lea.vmem %s396_s9, 32  ;;  %p569_p7 = scmp.lt.s32.totalorder %s396_s9, %s396_s9 }
 0x285   :  { %p565_p6 = scmp.ne.s32.totalorder %s396_s9, %s564_s12  ;;  %p570_p8 = scmp.lt.s32.totalorder %s564_s12, %s564_s12 }
 0x287   :  { %p571_p9 = por %p570_p8, %p569_p7 }
 0x289   :  { %p572_p10 = pnand %p571_p9, %p565_p6 }
 0x2e7   :  { %v362_v3 = vpop.permute.xlu0 %361 }
 0x2e8   :  { %364 = vst.msk [vmem:[%s702_s6] sm:$0xff] %vm81_vm2, %v362_v3 }
 0x2e9   :  { %366 = vst.msk [vmem:[#allocation8 - $0x7] sm:$0x80] %vm365_vm3, %v362_v3 }
 0x2eb   :  { %v379_v4 = vpop.permute.xlu0 %378 }
 0x2ec   :  { %381 = vst.msk [vmem:[#allocation8 - $0x6] sm:$0x80] %vm365_vm3, %v379_v4 }
 0x2ed   :  { %575 = shalt.err (!%p572_p10)
}
 0x2ee   :  { %398 = dma.vmem_to_hbm [thread:$0]  %s396_s9, 32, %s703_s7, [#allocation4]  }
 0x2ef   :  { %v374_v5 = vpop.permute.xlu0 %373 }
 0x2f0   :  { %377 = vst.msk [vmem:[%s702_s6] sm:$0xff] %vm376_vm4, %v374_v5 }
 0x2f1   :  { %588 = dma.done.wait [#allocation4], 32  }
 0x2f2   :  { %589 = vsyncadd [#allocation4], 4294967264 }
 0x2f3   :  { %590 = dma.done.wait [#allocation10], 32  }
 0x2f4   :  { %591 = vsyncadd [#allocation10], 4294967264 }
 0x2f5   :  { %417 = vsyncpa [#allocation3], 1 }
 0x2f6   :  { %418 = vsyncpa [#allocation6], 1 }
 0x2f7   :  { %419 = vsyncpa [#allocation4], 1 }
 0x2f8   :  { %420 = vsyncpa [#allocation10], 1 }

</bundles_post_ra>
